<compile_context>
chip_gen: v5e
topology: v5e:2x2
jax: 0.10.0
libtpu: 0.0.40
codegen_flags: <defaults>
</compile_context>

<pallas_src>
import functools

import jax
import jax.numpy as jnp
from jax.experimental import pallas as pl
from jax.experimental.pallas import tpu as pltpu

EPS = 1e-4
MOMENTUM = 0.1

_MAX_BLOCK_BYTES = 4 * 1024 * 1024      # target per-block payload (~4 MiB)
_VMEM_LIMIT_BYTES = 48 * 1024 * 1024    # explicit scoped VMEM limit (< v7x 64 MiB)


# ----------------------- pass 1: partial batch statistics -----------------------
def stats_kernel(x_ref, psum_ref):
    """Accumulate per-channel (sum, sum_sq) for this split's share of blocks."""
    first = jnp.logical_and(pl.program_id(1) == 0, pl.program_id(2) == 0)

    @pl.when(first)
    def _():
        psum_ref[...] = jnp.zeros_like(psum_ref)

    x = x_ref[...].astype(jnp.float32)               # (bn, C, hw_tile)
    xs = jnp.sum(x, axis=0)                          # (C, hw_tile)
    xq = jnp.sum(x * x, axis=0)                      # (C, hw_tile)
    s = jnp.sum(xs, axis=-1, keepdims=True)          # (C, 1)
    q = jnp.sum(xq, axis=-1, keepdims=True)          # (C, 1)
    psum_ref[...] += jnp.concatenate([s, q], axis=-1)[None]   # (1, C, 2)


# ----------------------- pass 2: finalize (tiny, gridless) ----------------------
def finalize_kernel(psum_ref, rm_ref, rs_ref, w_ref, b_ref,
                    params_ref, new_rm_ref, new_rs_ref,
                    *, m_total, rmax, dmax):
    tot = jnp.sum(psum_ref[...], axis=0)             # (C, 2)
    inv_m = 1.0 / m_total
    mean = tot[:, 0:1] * inv_m                       # (C, 1)
    ex2 = tot[:, 1:2] * inv_m
    # Same formula as the module: clamp(E[x^2] - mean^2, min=eps), then sqrt.
    var = jnp.maximum(ex2 - mean * mean, EPS)
    std = jnp.sqrt(var)

    rm = rm_ref[...]
    rs = rs_ref[...]
    r = jnp.clip((std + EPS) / (rs + EPS), 1.0 / rmax, rmax)
    d = jnp.clip((mean - rm) / (rs + EPS), -dmax, dmax)

    w = w_ref[...]
    b = b_ref[...]
    # y = w * ((x - mean)/(std+eps) * r + d) + b  ==  x * scale + shift
    a = r / (std + EPS)
    scale = w * a
    shift = w * (d - mean * a) + b
    params_ref[...] = jnp.concatenate([scale, shift], axis=-1)   # (C, 2)

    # running buffer updates: buf += momentum * (batch_stat - buf)
    new_rm_ref[...] = rm + MOMENTUM * (mean - rm)
    new_rs_ref[...] = rs + MOMENTUM * (std - rs)


# ----------------------- pass 3: per-element fused FMA --------------------------
def norm_kernel(x_ref, params_ref, o_ref):
    scale = params_ref[:, 0:1]                       # (C, 1) -> broadcast on lanes
    shift = params_ref[:, 1:2]
    x = x_ref[...].astype(jnp.float32)               # (bn, C, hw_tile)
    o_ref[...] = (x * scale + shift).astype(o_ref.dtype)


# --------------------------------- tiling helper --------------------------------
def _pick_tiles(n, c, hw, dtype_bytes, max_block_bytes=_MAX_BLOCK_BYTES):
    """Pick (bn, hw_tile): lane-dense blocks of at most ~max_block_bytes."""
    if c * hw * dtype_bytes <= max_block_bytes:
        hw_tile = hw
    else:
        hw_tile = hw   # TODO(synk): masked tail for huge HW with no 128-divisor
        t = (max_block_bytes // (c * dtype_bytes)) // 128 * 128
        while t >= 128:
            if hw % t == 0:
                hw_tile = t
                break
            t -= 128
    bn = 1
    for cand in range(n, 0, -1):
        if n % cand == 0 and cand * c * hw_tile * dtype_bytes <= max_block_bytes:
            bn = cand
            break
    return bn, hw_tile


# ------------------------------------ wrapper ------------------------------------
def batch_renorm_forward(x_nchw, running_mean, running_std, weight, bias,
                         *, num_batches_tracked=20000):
    """Training-mode BatchRenorm forward.

    Returns (y, new_running_mean, new_running_std, new_num_batches_tracked).
    """
    N, C, H, W = x_nchw.shape
    HW = H * W
    M = N * HW
    in_dtype = x_nchw.dtype
    dtype_bytes = jnp.dtype(in_dtype).itemsize

    rmax = float(min(max(2.0 / 35000.0 * num_batches_tracked + 25.0 / 35.0, 1.0), 2.0))
    dmax = float(min(max(5.0 / 20000.0 * num_batches_tracked - 25.0 / 20.0, 0.0), 2.0))

    x3d = x_nchw.reshape(N, C, HW)       # free view: no transpose, no extra HBM pass

    bn, hw_tile = _pick_tiles(N, C, HW, dtype_bytes)
    n_b = N // bn
    n_hw = HW // hw_tile
    n_split = 2 if (n_hw >= 2 and n_hw % 2 == 0) else 1
    hw_per_split = n_hw // n_split

    rm = running_mean.reshape(C, 1).astype(jnp.float32)
    rs = running_std.reshape(C, 1).astype(jnp.float32)
    w = weight.reshape(C, 1).astype(jnp.float32)
    b = bias.reshape(C, 1).astype(jnp.float32)

    x_block = (bn, C, hw_tile)

    # ---- pass 1: per-channel partial (sum, sum_sq), split across cores ----
    psum = pl.pallas_call(
        stats_kernel,
        out_shape=jax.ShapeDtypeStruct((n_split, C, 2), jnp.float32),
        grid_spec=pltpu.PrefetchScalarGridSpec(
            num_scalar_prefetch=0,
            grid=(n_split, n_b, hw_per_split),
            in_specs=[pl.BlockSpec(
                x_block,
                lambda s, ni, j: (ni, 0, s * hw_per_split + j))],
            out_specs=pl.BlockSpec((1, C, 2), lambda s, ni, j: (s, 0, 0)),
        ),
        compiler_params=pltpu.CompilerParams(
            dimension_semantics=("parallel", "arbitrary", "arbitrary"),
            vmem_limit_bytes=_VMEM_LIMIT_BYTES),
    )(x3d)

    # ---- pass 2: tiny finalize -> fused per-channel scale/shift + new buffers ----
    vmem = pltpu.MemorySpace.VMEM
    params, new_rm, new_rs = pl.pallas_call(
        functools.partial(finalize_kernel, m_total=float(M), rmax=rmax, dmax=dmax),
        out_shape=(jax.ShapeDtypeStruct((C, 2), jnp.float32),
                   jax.ShapeDtypeStruct((C, 1), jnp.float32),
                   jax.ShapeDtypeStruct((C, 1), jnp.float32)),
        in_specs=[pl.BlockSpec(memory_space=vmem)] * 5,
        out_specs=(pl.BlockSpec(memory_space=vmem),
                   pl.BlockSpec(memory_space=vmem),
                   pl.BlockSpec(memory_space=vmem)),
    )(psum, rm, rs, w, b)

    # ---- pass 3: y = x * scale + shift (lane-dense streaming FMA) ----
    y3d = pl.pallas_call(
        norm_kernel,
        out_shape=jax.ShapeDtypeStruct((N, C, HW), in_dtype),
        grid_spec=pltpu.PrefetchScalarGridSpec(
            num_scalar_prefetch=0,
            grid=(n_b, n_hw),
            in_specs=[pl.BlockSpec(x_block, lambda ni, j: (ni, 0, j)),
                      pl.BlockSpec((C, 2), lambda ni, j: (0, 0))],
            out_specs=pl.BlockSpec(x_block, lambda ni, j: (ni, 0, j)),
        ),
        compiler_params=pltpu.CompilerParams(
            dimension_semantics=("parallel", "parallel"),
            vmem_limit_bytes=_VMEM_LIMIT_BYTES),
    )(x3d, params)

    y = y3d.reshape(N, C, H, W)
    return y, new_rm.reshape(C), new_rs.reshape(C), num_batches_tracked + 1


# ------------------------------ pure-JAX reference -------------------------------
def reference(x_nchw, rm, rs, w, b, num_batches_tracked):
    N, C, H, W = x_nchw.shape
    rmax = float(min(max(2.0 / 35000.0 * num_batches_tracked + 25.0 / 35.0, 1.0), 2.0))
    dmax = float(min(max(5.0 / 20000.0 * num_batches_tracked - 25.0 / 20.0, 0.0), 2.0))
    xt = jnp.transpose(x_nchw, (0, 2, 3, 1)).reshape(-1, C).astype(jnp.float32)
    mean = xt.mean(0)
    var = jnp.maximum((xt * xt).mean(0) - mean * mean, EPS)
    std = jnp.sqrt(var)
    r = jnp.clip((std + EPS) / (rs + EPS), 1.0 / rmax, rmax)
    d = jnp.clip((mean - rm) / (rs + EPS), -dmax, dmax)
    y = (xt - mean) / (std + EPS) * r + d
    y = w * y + b
    y = jnp.transpose(y.reshape(N, H, W, C), (0, 3, 1, 2))
    new_rm = rm + MOMENTUM * (mean - rm)
    new_rs = rs + MOMENTUM * (std - rs)
    return y, new_rm, new_rs


if __name__ == "__main__":
    key = jax.random.PRNGKey(0)
    k1, k2, k3, k4, k5 = jax.random.split(key, 5)

    N, C, H, W = 2, 4, 16, 16                       # x: (2, 4, 16, 16) NCHW
    x = jax.random.normal(k1, (N, C, H, W), jnp.float32) * 2.0 + 0.5

    running_mean = 0.1 * jax.random.normal(k2, (C,), jnp.float32)
    running_std = 1.0 + 0.1 * jax.random.uniform(k3, (C,), jnp.float32)
    weight = 1.0 + 0.05 * jax.random.normal(k4, (C,), jnp.float32)
    bias = 0.05 * jax.random.normal(k5, (C,), jnp.float32)

    nbt = 20000
    y, new_rm, new_rs, new_nbt = batch_renorm_forward(
        x, running_mean, running_std, weight, bias, num_batches_tracked=nbt)
    jax.block_until_ready((y, new_rm, new_rs))

    y_ref, rm_ref, rs_ref = reference(x, running_mean, running_std, weight,
                                      bias, nbt)
    assert y.shape == (N, C, H, W)
    assert jnp.allclose(y, y_ref, atol=1e-4, rtol=1e-4)
    assert jnp.allclose(new_rm, rm_ref, atol=1e-5, rtol=1e-5)
    assert jnp.allclose(new_rs, rs_ref, atol=1e-5, rtol=1e-5)
    assert new_nbt == nbt + 1

    print("KERNEL_OK")
</pallas_src>

<mosaic_0001>
module attributes {stable_mosaic.version = 11 : i64} {
  func.func @stats_kernel(%arg0: i32, %arg1: i32, %arg2: i32, %arg3: memref<2x4x256xf32, #tpu.memory_space<vmem>>, %arg4: memref<1x4x2xf32, #tpu.memory_space<vmem>>) attributes {dimension_semantics = [#tpu.dimension_semantics<parallel>, #tpu.dimension_semantics<arbitrary>, #tpu.dimension_semantics<arbitrary>], iteration_bounds = array<i64: 1, 1, 1>, scalar_prefetch = 0 : i64, scratch_operands = 0 : i64, tpu.core_type = #tpu.core_type<tc>, window_params = [{transform_indices = @transform_0, window_bounds = array<i64: 2, 4, 256>}, {transform_indices = @transform_1, window_bounds = array<i64: 1, 4, 2>}]} {
    %c0_i32 = arith.constant 0 : i32
    %0 = arith.cmpi eq, %arg1, %c0_i32 : i32
    %c0_i32_0 = arith.constant 0 : i32
    %1 = arith.cmpi eq, %arg2, %c0_i32_0 : i32
    %2 = arith.andi %0, %1 : i1
    %3 = arith.extui %2 : i1 to i32
    %c0_i32_1 = arith.constant 0 : i32
    %4 = arith.cmpi ne, %3, %c0_i32_1 : i32
    scf.if %4 {
      %cst_13 = arith.constant 0.000000e+00 : f32
      %18 = vector.broadcast %cst_13 : f32 to vector<1x4x2xf32>
      %c0_14 = arith.constant 0 : index
      %c0_15 = arith.constant 0 : index
      %c0_16 = arith.constant 0 : index
      %19 = vector.load %arg4[%c0_14, %c0_15, %c0_16] : memref<1x4x2xf32, #tpu.memory_space<vmem>>, vector<1x4x2xf32>
      tpu.vector_store %arg4[%c0_14, %c0_15, %c0_16], %18 {strides = array<i32>} : memref<1x4x2xf32, #tpu.memory_space<vmem>>, vector<1x4x2xf32>,
    } else {
    }
    %c0 = arith.constant 0 : index
    %c0_2 = arith.constant 0 : index
    %c0_3 = arith.constant 0 : index
    %5 = vector.load %arg3[%c0, %c0_2, %c0_3] : memref<2x4x256xf32, #tpu.memory_space<vmem>>, vector<2x4x256xf32>
    %cst = arith.constant dense<0.000000e+00> : vector<4x256xf32>
    %6 = vector.multi_reduction <add>, %5, %cst [0] : vector<2x4x256xf32> to vector<4x256xf32>
    %7 = arith.mulf %5, %5 : vector<2x4x256xf32>
    %cst_4 = arith.constant dense<0.000000e+00> : vector<4x256xf32>
    %8 = vector.multi_reduction <add>, %7, %cst_4 [0] : vector<2x4x256xf32> to vector<4x256xf32>
    %cst_5 = arith.constant dense<0.000000e+00> : vector<4xf32>
    %9 = vector.multi_reduction <add>, %6, %cst_5 [1] : vector<4x256xf32> to vector<4xf32>
    %10 = vector.shape_cast %9 : vector<4xf32> to vector<4x1xf32>
    %cst_6 = arith.constant dense<0.000000e+00> : vector<4xf32>
    %11 = vector.multi_reduction <add>, %8, %cst_6 [1] : vector<4x256xf32> to vector<4xf32>
    %12 = vector.shape_cast %11 : vector<4xf32> to vector<4x1xf32>
    %c0_7 = arith.constant 0 : index
    %c0_8 = arith.constant 0 : index
    %c0_9 = arith.constant 0 : index
    %13 = vector.load %arg4[%c0_7, %c0_8, %c0_9] : memref<1x4x2xf32, #tpu.memory_space<vmem>>, vector<1x4x2xf32>
    %14 = tpu.concatenate %10, %12 in 1 : vector<4x1xf32>, vector<4x1xf32> -> vector<4x2xf32>
    %15 = vector.shape_cast %14 : vector<4x2xf32> to vector<1x4x2xf32>
    %16 = arith.addf %13, %15 : vector<1x4x2xf32>
    %c0_10 = arith.constant 0 : index
    %c0_11 = arith.constant 0 : index
    %c0_12 = arith.constant 0 : index
    %17 = vector.load %arg4[%c0_10, %c0_11, %c0_12] : memref<1x4x2xf32, #tpu.memory_space<vmem>>, vector<1x4x2xf32>
    tpu.vector_store %arg4[%c0_10, %c0_11, %c0_12], %16 {strides = array<i32>} : memref<1x4x2xf32, #tpu.memory_space<vmem>>, vector<1x4x2xf32>,
    return
  }
  func.func @transform_0(%arg0: i32, %arg1: i32, %arg2: i32) -> (i32, i32, i32) {
    %c1_i32 = arith.constant 1 : i32
    %0 = arith.muli %arg0, %c1_i32 : i32
    %1 = arith.addi %0, %arg2 : i32
    %c0_i32 = arith.constant 0 : i32
    %c0_i32_0 = arith.constant 0 : i32
    return %arg1, %c0_i32, %1 : i32, i32, i32
  }
  func.func @transform_1(%arg0: i32, %arg1: i32, %arg2: i32) -> (i32, i32, i32) {
    %c0_i32 = arith.constant 0 : i32
    %c0_i32_0 = arith.constant 0 : i32
    %c0_i32_1 = arith.constant 0 : i32
    return %arg0, %c0_i32, %c0_i32_0 : i32, i32, i32
  }
}

</mosaic_0001>

<bundles_post_ra>
// kernel: tpu_custom_call.1
= control target key start
LH: loop header
LB: loop body
LE: loop exit
PB: predicated region body
PF: predicated region fallthrough
CT: control target
= control target key end

     0   :  { %6 = vsyncpa [#allocation3], 0  ;;  %s132_s9 = smov [#allocation2]   ;;  %s133_s11 = smov 128   ;;  %s170_s0 = inlined_call_operand.hbm [shape: f32[2,4,256], index: 0, kind: input, shape index: {}]   ;;  %s171_s1 = inlined_call_operand.vmem [shape: f32[1,4,2], index: 1, kind: output, shape index: {}]  }
   0x1   :  { %s15_s8 = sshll.u32 %s170_s0, 4  ;;  %s17_s10 = sshll.u32 %s132_s9, 4  ;;  %s16_s8 = int_to_ptr.hbm [resolvable:$true] %s15_s8  ;;  %s18_s10 = int_to_ptr.vmem [resolvable:$true] %s17_s10 }
   0x2   :  { %s134_s12 = smov 8  }
   0x3   :  { %23 = dma.hbm_to_vmem [thread:$0]  %s16_s8, 256, %s18_s10, [#allocation3], %s133_s11, %s133_s11, %s134_s12  }
   0x4   :  { %130 = dma.done.wait [#allocation3], 256  }
   0x5   :  { %131 = vsyncadd [#allocation3], 4294967040  ;;  %v38_v0 = vld [vmem:[#allocation2] sm:$0xff]  ;;  %v39_v1 = vld [vmem:[#allocation2 + $0x8] sm:$0xff]  ;;  %vm53_vm0 = vcmask 1043456   ;;  %vm36_vm1 = vcmask 11264  }
   0x6   :  { %42 = vst [vmem:[#allocation1] ss:$2 sm:$0xff] %v38_v0  ;;  %v60_v2 = vmul.f32 %v38_v0, %v38_v0  ;;  %v61_v3 = vmul.f32 %v39_v1, %v39_v1  ;;  %v135_v30 = vmov 0.0   ;;  %vm92_vm2 = vcmask 7168  }
   0x7   :  { %46 = vst [vmem:[#allocation1 + $0x10] ss:$2 sm:$0xff] %v39_v1 }
   0x8   :  { %37 = vst.msk [vmem:[%s171_s1] sm:$0xf] %vm36_vm1, %v135_v30 }
   0xd   :  { %v43_v4 = vld.sshfl [vmem:[#allocation1] sm:$0xff pattern:$0x75316420]  ;;  %v44_v5 = vld.sshfl [vmem:[#allocation1 + $0x8] sm:$0xff pattern:$0x75316420] }
   0xe   :  { %v47_v6 = vld.sshfl [vmem:[#allocation1 + $0x10] sm:$0xff pattern:$0x75316420]  ;;  %v48_v7 = vld.sshfl [vmem:[#allocation1 + $0x18] sm:$0xff pattern:$0x75316420] }
   0xf   :  { %v54_v8 = vsel %vm53_vm0, %v43_v4, 0.0  ;;  %v55_v9 = vsel %vm53_vm0, %v47_v6, 0.0  ;;  %v57_v10 = vsel %vm53_vm0, %v44_v5, 0.0  ;;  %v58_v11 = vsel %vm53_vm0, %v48_v7, 0.0  ;;  %64 = vst [vmem:[#allocation1] ss:$2 sm:$0xff] %v60_v2 }
  0x10   :  { %v56_v12 = vadd.f32 %v55_v9, %v54_v8  ;;  %v59_v13 = vadd.f32 %v58_v11, %v57_v10  ;;  %68 = vst [vmem:[#allocation1 + $0x10] ss:$2 sm:$0xff] %v61_v3  ;;  %v91_v32 = vld [vmem:[%s171_s1] sm:$0xf] }
  0x12   :  { %v81_v14 = vsel %vm53_vm0, %v56_v12, 0.0  ;;  %v82_v15 = vsel %vm53_vm0, %v59_v13, 0.0 }
  0x13   :  { %v83_v16 = vadd.f32 %v82_v15, %v81_v14 }
  0x15   :  { %84 = vadd.xlane.f32.xlu0 %v83_v16 }
  0x16   :  { %v65_v17 = vld.sshfl [vmem:[#allocation1] sm:$0xff pattern:$0x75316420]  ;;  %v66_v18 = vld.sshfl [vmem:[#allocation1 + $0x8] sm:$0xff pattern:$0x75316420] }
  0x17   :  { %v69_v19 = vld.sshfl [vmem:[#allocation1 + $0x10] sm:$0xff pattern:$0x75316420]  ;;  %v70_v20 = vld.sshfl [vmem:[#allocation1 + $0x18] sm:$0xff pattern:$0x75316420] }
  0x18   :  { %v75_v21 = vsel %vm53_vm0, %v65_v17, 0.0  ;;  %v76_v22 = vsel %vm53_vm0, %v69_v19, 0.0  ;;  %v78_v23 = vsel %vm53_vm0, %v66_v18, 0.0  ;;  %v79_v24 = vsel %vm53_vm0, %v70_v20, 0.0 }
  0x19   :  { %v77_v25 = vadd.f32 %v76_v22, %v75_v21  ;;  %v80_v26 = vadd.f32 %v79_v24, %v78_v23 }
  0x1b   :  { %v86_v27 = vsel %vm53_vm0, %v77_v25, 0.0  ;;  %v87_v28 = vsel %vm53_vm0, %v80_v26, 0.0 }
  0x1c   :  { %v88_v29 = vadd.f32 %v87_v28, %v86_v27 }
  0x1e   :  { %89 = vadd.xlane.f32.xlu0 %v88_v29 }
  0x88   :  { %v85_v31 = vpop.xlane.xlu0 %84 }
  0x91   :  { %v90_v33 = vpop.xlane.xlu0 %89 }
  0x92   :  { %v93_v34 = vsel %vm92_vm2, %v85_v31, %v90_v33 }
  0x93   :  { %v94_v35 = vadd.f32 %v93_v34, %v91_v32 }
  0x95   :  { %96 = vst.msk [vmem:[%s171_s1] sm:$0xf] %vm36_vm1, %v94_v35 }
  0x96   :  { %101 = vsyncpa [#allocation3], 1 }

</bundles_post_ra>
